<compile_context>
chip_gen: v5e
topology: v5e:2x2
jax: 0.10.0
libtpu: 0.0.40
codegen_flags: <defaults>
</compile_context>

<pallas_src>
import jax
import jax.numpy as jnp
from jax import lax
from jax.experimental import pallas as pl
from jax.experimental.pallas import tpu as pltpu


def _self_attention_kernel(x_ref, mT_ref, wkb_ref, wv_ref, bv_ref, gamma_ref,
                           out_ref, xc_scr, v_scr):
    """One (batch, query-tile) grid step.

    x_ref    : (1, C, N)  full f32 feature map of this batch element (resident)
    mT_ref   : (C, C)     (Wq^T Wk)^T = Wk^T Wq           (compute dtype)
    wkb_ref  : (C, 1)     (bq^T Wk)^T  (softmax-surviving bias cross term, f32)
    wv_ref   : (C, C)     value-conv weight                (compute dtype)
    bv_ref   : (C, 1)     value-conv bias (f32)
    gamma_ref: (1, 1)     gamma scalar (SMEM, f32)
    out_ref  : (1, C, TQ) output tile (f32, lane-dense last dim)
    xc_scr   : (C, N)     per-batch compute-dtype cast of x        (scratch)
    v_scr    : (C, N)     per-batch value projection Wv x + bv     (scratch)
    """
    q = pl.program_id(1)
    TQ = out_ref.shape[2]
    cdt = mT_ref.dtype                       # MXU operand dtype (bf16 or f32)

    # ---- per-batch work: runs only on the first query tile of each batch ----
    @pl.when(q == 0)
    def _():
        xf = x_ref[0]                                        # (C, N) f32
        xc = xf.astype(cdt)
        xc_scr[...] = xc
        v_f32 = jnp.dot(wv_ref[...], xc,
                        preferred_element_type=jnp.float32) + bv_ref[...]
        v_scr[...] = v_f32.astype(cdt)

    # ---- per-tile work ----
    start = q * TQ
    if TQ % 128 == 0:                         # static (trace-time) alignment hint
        start = pl.multiple_of(start, 128)
    xq_f32 = x_ref[0, :, pl.ds(start, TQ)]                   # (C, TQ) f32
    xq_c = xq_f32.astype(cdt)

    # u[:, n] = (Wq^T Wk)^T q-col + (bq^T Wk)^T   (terms constant along the key
    # axis cancel under the softmax and are omitted)
    u = jnp.dot(mT_ref[...], xq_c, preferred_element_type=jnp.float32)  # (C, TQ)
    u = u + wkb_ref[...]                                                # + (C, 1)
    u_c = u.astype(cdt)

    # energy^T[m, n] = k_m . q_n   (keys on the sublane axis; transposed-LHS
    # matmul is MXU-native, result is already in PV-friendly orientation)
    xc = xc_scr[...]                                                    # (C, N)
    e_t = lax.dot_general(xc, u_c, (((0,), (0,)), ((), ())),
                          preferred_element_type=jnp.float32)           # (N, TQ)

    # softmax over the key axis (axis 0), normalization deferred
    m_col = jnp.max(e_t, axis=0, keepdims=True)                         # (1, TQ)
    p = jnp.exp(e_t - m_col)                                            # (N, TQ)
    denom = jnp.sum(p, axis=0, keepdims=True)                           # (1, TQ)

    # out[c, n] = sum_m v[c, m] * p[m, n] / denom[n]
    o = jnp.dot(v_scr[...], p.astype(cdt),
                preferred_element_type=jnp.float32)                     # (C, TQ)
    o = o * pl.reciprocal(denom, approx=True)

    gamma = gamma_ref[0, 0]
    out_ref[0] = gamma * o + xq_f32            # residual stays in f32


def _pick_query_tile(n, max_tq):
    """Largest multiple of 128 that divides N (capped at max_tq); else full N."""
    if n % 128 == 0:
        tq = min(max_tq, n)
        tq -= tq % 128
        while tq >= 128:
            if n % tq == 0:
                return tq
            tq -= 128
    return n


def self_attention_pallas(x_nchw, wq, bq, wk, bk, wv, bv, gamma, *,
                          compute_dtype=jnp.bfloat16, tq=None):
    """SAGAN SelfAttention forward.  x_nchw: (B, C, W, H) f32 -> (B, C, W, H) f32."""
    B, C, W, H = x_nchw.shape
    N = W * H
    x_bcn = x_nchw.reshape(B, C, N)                 # free reshape, no transpose

    # Generation-aware query tile and VMEM budget.
    try:
        phys_vmem = int(pltpu.get_tpu_info().vmem_capacity_bytes)
    except Exception:
        phys_vmem = 64 * 1024 * 1024                # conservative fallback (v7x-sized)
    max_tq = 256 if phys_vmem <= 64 * 1024 * 1024 else 512
    TQ = _pick_query_tile(N, max_tq) if tq is None else tq
    assert N % TQ == 0
    nq = N // TQ
    vmem_limit = int(phys_vmem * 3 // 4)            # 25% headroom on every gen

    cdt = jnp.dtype(compute_dtype)
    m_t = (wk.T @ wq).astype(cdt)                       # (C, C) = (Wq^T Wk)^T
    wkb_col = (bq @ wk).reshape(C, 1).astype(jnp.float32)   # (C, 1) = (bq^T Wk)^T
    wv_c = wv.astype(cdt)                               # (C, C)
    bv2 = bv.reshape(C, 1).astype(jnp.float32)          # (C, 1)
    gamma2 = jnp.asarray(gamma, jnp.float32).reshape(1, 1)

    flops = int(2 * B * (2 * C * N * N + 2 * C * C * N))
    cost = pl.CostEstimate(flops=flops,
                           transcendentals=int(B * N * N),
                           bytes_accessed=int(8 * B * C * N + 16 * C * C))

    out_bcn = pl.pallas_call(
        _self_attention_kernel,
        out_shape=jax.ShapeDtypeStruct((B, C, N), jnp.float32),
        grid_spec=pltpu.PrefetchScalarGridSpec(
            num_scalar_prefetch=0,
            grid=(B, nq),
            in_specs=[
                pl.BlockSpec((1, C, N), lambda b, q: (b, 0, 0)),    # x (resident per b)
                pl.BlockSpec((C, C), lambda b, q: (0, 0)),          # (Wq^T Wk)^T
                pl.BlockSpec((C, 1), lambda b, q: (0, 0)),          # (bq^T Wk)^T
                pl.BlockSpec((C, C), lambda b, q: (0, 0)),          # Wv
                pl.BlockSpec((C, 1), lambda b, q: (0, 0)),          # bv
                pl.BlockSpec(memory_space=pltpu.MemorySpace.SMEM),  # gamma
            ],
            out_specs=pl.BlockSpec((1, C, TQ), lambda b, q: (b, 0, q)),
            scratch_shapes=[
                pltpu.VMEM((C, N), cdt),   # per-batch compute-dtype feature map
                pltpu.VMEM((C, N), cdt),   # per-batch value projection cache
            ],
        ),
        compiler_params=pltpu.CompilerParams(
            # B parallel (v7x: both TensorCores get work for B>=2); q must be
            # "arbitrary" because the per-batch scratch is filled at q == 0.
            dimension_semantics=("parallel", "arbitrary"),
            vmem_limit_bytes=vmem_limit,
        ),
        cost_estimate=cost,
    )(x_bcn, m_t, wkb_col, wv_c, bv2, gamma2)

    return out_bcn.reshape(B, C, W, H)


# ------------------------- pure-JAX reference (mirrors PyTorch) ---------------
def self_attention_ref(x, wq, bq, wk, bk, wv, bv, gamma):
    B, C, W, H = x.shape
    N = W * H
    xf = x.reshape(B, C, N)
    q = jnp.einsum('oc,bcn->bon', wq, xf) + bq[None, :, None]   # (B, Cq, N)
    k = jnp.einsum('oc,bcn->bon', wk, xf) + bk[None, :, None]   # (B, Cq, N)
    v = jnp.einsum('oc,bcn->bon', wv, xf) + bv[None, :, None]   # (B, C, N)
    energy = jnp.einsum('bcn,bcm->bnm', q, k)                   # (B, N, N)
    attn = jax.nn.softmax(energy, axis=-1)
    out = jnp.einsum('bcm,bnm->bcn', v, attn)                   # (B, C, N)
    return gamma * out.reshape(B, C, W, H) + x


def xavier_uniform(key, out_ch, in_ch):
    # Matches init.xavier_uniform_ on a (out, in, 1, 1) conv weight.
    bound = (6.0 / (in_ch + out_ch)) ** 0.5
    return jax.random.uniform(key, (out_ch, in_ch), jnp.float32, -bound, bound)


if __name__ == "__main__":
    B, C, W, H = 2, 16, 16, 16          # N = W*H = 256 (multiple of 128)
    Cq = C // 8

    key = jax.random.PRNGKey(0)
    kx, kq, kk, kv, kb1, kb2, kb3 = jax.random.split(key, 7)

    x = jax.random.normal(kx, (B, C, W, H), jnp.float32)
    wq = xavier_uniform(kq, Cq, C)
    wk = xavier_uniform(kk, Cq, C)
    wv = xavier_uniform(kv, C, C)
    zeros_q = jnp.zeros((Cq,), jnp.float32)
    zeros_v = jnp.zeros((C,), jnp.float32)
    gamma0 = jnp.zeros((), jnp.float32)        # faithful init: gamma = 0, biases = 0

    # 1) Faithful-to-init run (default bf16 MXU path, auto TQ): gamma == 0 => out == x.
    out0 = self_attention_pallas(x, wq, zeros_q, wk, zeros_q, wv, zeros_v, gamma0)
    jax.block_until_ready(out0)
    assert out0.shape == (B, C, W, H)
    assert jnp.allclose(out0, x, atol=1e-6)

    # 2) Nonzero gamma + nonzero biases (exercises the bias cross-term), f32
    #    compute path, TQ=128 (two query tiles, per-batch scratch reuse): check vs ref.
    gamma_nz = jnp.asarray(0.7, jnp.float32)
    bq = 0.1 * jax.random.normal(kb1, (Cq,), jnp.float32)
    bk = 0.1 * jax.random.normal(kb2, (Cq,), jnp.float32)
    bv = 0.1 * jax.random.normal(kb3, (C,), jnp.float32)
    ref = self_attention_ref(x, wq, bq, wk, bk, wv, bv, gamma_nz)
    out_f32 = self_attention_pallas(x, wq, bq, wk, bk, wv, bv, gamma_nz,
                                    compute_dtype=jnp.float32, tq=128)
    jax.block_until_ready(out_f32)
    assert jnp.allclose(out_f32, ref, atol=1e-2, rtol=1e-2)   # approx reciprocal

    # 3) Same problem on the bf16 MXU fast path (v6e/v7x): looser tolerance.
    out_bf16 = self_attention_pallas(x, wq, bq, wk, bk, wv, bv, gamma_nz, tq=128)
    jax.block_until_ready(out_bf16)
    assert jnp.allclose(out_bf16, ref, atol=1e-1, rtol=1e-1)

    print("KERNEL_OK")
</pallas_src>

<mosaic_0001>
module attributes {stable_mosaic.version = 11 : i64} {
  func.func @_self_attention_kernel(%arg0: i32, %arg1: i32, %arg2: memref<1x16x256xf32, #tpu.memory_space<vmem>>, %arg3: memref<16x16xbf16, #tpu.memory_space<vmem>>, %arg4: memref<16x1xf32, #tpu.memory_space<vmem>>, %arg5: memref<16x16xbf16, #tpu.memory_space<vmem>>, %arg6: memref<16x1xf32, #tpu.memory_space<vmem>>, %arg7: memref<1x1xf32, #tpu.memory_space<smem>>, %arg8: memref<1x16x256xf32, #tpu.memory_space<vmem>>, %arg9: memref<16x256xbf16, #tpu.memory_space<vmem>>, %arg10: memref<16x256xbf16, #tpu.memory_space<vmem>>) attributes {dimension_semantics = [#tpu.dimension_semantics<parallel>, #tpu.dimension_semantics<arbitrary>], iteration_bounds = array<i64: 2, 1>, scalar_prefetch = 0 : i64, scratch_operands = 2 : i64, tpu.core_type = #tpu.core_type<tc>, window_params = [{transform_indices = @transform_0, window_bounds = array<i64: 1, 16, 256>}, {pipeline_mode = #tpu.pipeline_mode<synchronous>, transform_indices = @transform_1, window_bounds = array<i64: 16, 16>}, {pipeline_mode = #tpu.pipeline_mode<synchronous>, transform_indices = @transform_2, window_bounds = array<i64: 16, 1>}, {pipeline_mode = #tpu.pipeline_mode<synchronous>, transform_indices = @transform_3, window_bounds = array<i64: 16, 16>}, {pipeline_mode = #tpu.pipeline_mode<synchronous>, transform_indices = @transform_4, window_bounds = array<i64: 16, 1>}, {transform_indices = @transform_5, window_bounds = array<i64: 1, 1>}, {transform_indices = @transform_6, window_bounds = array<i64: 1, 16, 256>}]} {
    %c0_i32 = arith.constant 0 : i32
    %0 = arith.cmpi eq, %arg1, %c0_i32 : i32
    %1 = arith.extui %0 : i1 to i32
    %c0_i32_0 = arith.constant 0 : i32
    %2 = arith.cmpi ne, %1, %c0_i32_0 : i32
    scf.if %2 {
      %c0_19 = arith.constant 0 : index
      %c0_20 = arith.constant 0 : index
      %c0_21 = arith.constant 0 : index
      %37 = vector.load %arg2[%c0_19, %c0_20, %c0_21] : memref<1x16x256xf32, #tpu.memory_space<vmem>>, vector<1x16x256xf32>
      %38 = vector.shape_cast %37 : vector<1x16x256xf32> to vector<16x256xf32>
      %39 = arith.truncf %38 : vector<16x256xf32> to vector<16x256xbf16>
      %c0_22 = arith.constant 0 : index
      %c0_23 = arith.constant 0 : index
      %40 = vector.load %arg9[%c0_22, %c0_23] : memref<16x256xbf16, #tpu.memory_space<vmem>>, vector<16x256xbf16>
      tpu.vector_store %arg9[%c0_22, %c0_23], %39 {strides = array<i32>} : memref<16x256xbf16, #tpu.memory_space<vmem>>, vector<16x256xbf16>,
      %c0_24 = arith.constant 0 : index
      %c0_25 = arith.constant 0 : index
      %41 = vector.load %arg5[%c0_24, %c0_25] : memref<16x16xbf16, #tpu.memory_space<vmem>>, vector<16x16xbf16>
      %cst_26 = arith.constant dense<0.000000e+00> : vector<16x256xf32>
      %42 = tpu.matmul %41, %39, %cst_26 {dimension_numbers = #tpu.dot_dimension_numbers<[1], [0], [0], [1], [0, 0, 1, 1], [], []>} : vector<16x16xbf16>, vector<16x256xbf16>, vector<16x256xf32> -> vector<16x256xf32>
      %c0_27 = arith.constant 0 : index
      %c0_28 = arith.constant 0 : index
      %43 = vector.load %arg6[%c0_27, %c0_28] : memref<16x1xf32, #tpu.memory_space<vmem>>, vector<16x1xf32>
      %44 = vector.broadcast %43 : vector<16x1xf32> to vector<16x256xf32>
      %45 = arith.addf %42, %44 : vector<16x256xf32>
      %46 = arith.truncf %45 : vector<16x256xf32> to vector<16x256xbf16>
      %c0_29 = arith.constant 0 : index
      %c0_30 = arith.constant 0 : index
      %47 = vector.load %arg10[%c0_29, %c0_30] : memref<16x256xbf16, #tpu.memory_space<vmem>>, vector<16x256xbf16>
      tpu.vector_store %arg10[%c0_29, %c0_30], %46 {strides = array<i32>} : memref<16x256xbf16, #tpu.memory_space<vmem>>, vector<16x256xbf16>,
    } else {
    }
    %c256_i32 = arith.constant 256 : i32
    %3 = arith.muli %arg1, %c256_i32 : i32
    %4 = tpu.assume_multiple %3, 128 : i32
    %c0 = arith.constant 0 : index
    %c0_1 = arith.constant 0 : index
    %5 = arith.index_cast %4 : i32 to index
    %6 = vector.load %arg2[%c0, %c0_1, %5] : memref<1x16x256xf32, #tpu.memory_space<vmem>>, vector<1x16x256xf32>
    %7 = vector.shape_cast %6 : vector<1x16x256xf32> to vector<16x256xf32>
    %8 = arith.truncf %7 : vector<16x256xf32> to vector<16x256xbf16>
    %c0_2 = arith.constant 0 : index
    %c0_3 = arith.constant 0 : index
    %9 = vector.load %arg3[%c0_2, %c0_3] : memref<16x16xbf16, #tpu.memory_space<vmem>>, vector<16x16xbf16>
    %cst = arith.constant dense<0.000000e+00> : vector<16x256xf32>
    %10 = tpu.matmul %9, %8, %cst {dimension_numbers = #tpu.dot_dimension_numbers<[1], [0], [0], [1], [0, 0, 1, 1], [], []>} : vector<16x16xbf16>, vector<16x256xbf16>, vector<16x256xf32> -> vector<16x256xf32>
    %c0_4 = arith.constant 0 : index
    %c0_5 = arith.constant 0 : index
    %11 = vector.load %arg4[%c0_4, %c0_5] : memref<16x1xf32, #tpu.memory_space<vmem>>, vector<16x1xf32>
    %12 = vector.broadcast %11 : vector<16x1xf32> to vector<16x256xf32>
    %13 = arith.addf %10, %12 : vector<16x256xf32>
    %14 = arith.truncf %13 : vector<16x256xf32> to vector<16x256xbf16>
    %c0_6 = arith.constant 0 : index
    %c0_7 = arith.constant 0 : index
    %15 = vector.load %arg9[%c0_6, %c0_7] : memref<16x256xbf16, #tpu.memory_space<vmem>>, vector<16x256xbf16>
    %cst_8 = arith.constant dense<0.000000e+00> : vector<256x256xf32>
    %16 = tpu.matmul %15, %14, %cst_8 {dimension_numbers = #tpu.dot_dimension_numbers<[0], [0], [1], [1], [0, 1, 1, 1], [], []>} : vector<16x256xbf16>, vector<16x256xbf16>, vector<256x256xf32> -> vector<256x256xf32>
    %cst_9 = arith.constant dense<0xFF800000> : vector<256xf32>
    %17 = vector.multi_reduction <maximumf>, %16, %cst_9 [0] : vector<256x256xf32> to vector<256xf32>
    %18 = vector.shape_cast %17 : vector<256xf32> to vector<1x256xf32>
    %19 = vector.broadcast %18 : vector<1x256xf32> to vector<256x256xf32>
    %20 = arith.subf %16, %19 : vector<256x256xf32>
    %21 = math.exp %20 : vector<256x256xf32>
    %cst_10 = arith.constant dense<0.000000e+00> : vector<256xf32>
    %22 = vector.multi_reduction <add>, %21, %cst_10 [0] : vector<256x256xf32> to vector<256xf32>
    %23 = vector.shape_cast %22 : vector<256xf32> to vector<1x256xf32>
    %c0_11 = arith.constant 0 : index
    %c0_12 = arith.constant 0 : index
    %24 = vector.load %arg10[%c0_11, %c0_12] : memref<16x256xbf16, #tpu.memory_space<vmem>>, vector<16x256xbf16>
    %25 = arith.truncf %21 : vector<256x256xf32> to vector<256x256xbf16>
    %cst_13 = arith.constant dense<0.000000e+00> : vector<16x256xf32>
    %26 = tpu.matmul %24, %25, %cst_13 {dimension_numbers = #tpu.dot_dimension_numbers<[1], [0], [0], [1], [0, 0, 1, 1], [], []>} : vector<16x256xbf16>, vector<256x256xbf16>, vector<16x256xf32> -> vector<16x256xf32>
    %27 = tpu.reciprocal %23 {approx = true} : vector<1x256xf32> -> vector<1x256xf32>
    %28 = vector.broadcast %27 : vector<1x256xf32> to vector<16x256xf32>
    %29 = arith.mulf %26, %28 : vector<16x256xf32>
    %c0_14 = arith.constant 0 : index
    %c0_15 = arith.constant 0 : index
    %30 = memref.load %arg7[%c0_14, %c0_15] : memref<1x1xf32, #tpu.memory_space<smem>>
    %31 = vector.broadcast %30 : f32 to vector<16x256xf32>
    %32 = arith.mulf %31, %29 : vector<16x256xf32>
    %33 = arith.addf %32, %7 : vector<16x256xf32>
    %c0_16 = arith.constant 0 : index
    %c0_17 = arith.constant 0 : index
    %c0_18 = arith.constant 0 : index
    %34 = vector.load %arg8[%c0_16, %c0_17, %c0_18] : memref<1x16x256xf32, #tpu.memory_space<vmem>>, vector<1x16x256xf32>
    %35 = vector.shape_cast %34 : vector<1x16x256xf32> to vector<16x256xf32>
    %36 = vector.shape_cast %33 : vector<16x256xf32> to vector<1x16x256xf32>
    tpu.vector_store %arg8[%c0_16, %c0_17, %c0_18], %36 {strides = array<i32>} : memref<1x16x256xf32, #tpu.memory_space<vmem>>, vector<1x16x256xf32>,
    return
  }
  func.func @transform_0(%arg0: i32, %arg1: i32) -> (i32, i32, i32) {
    %c0_i32 = arith.constant 0 : i32
    %c0_i32_0 = arith.constant 0 : i32
    %c0_i32_1 = arith.constant 0 : i32
    return %arg0, %c0_i32, %c0_i32_0 : i32, i32, i32
  }
  func.func @transform_1(%arg0: i32, %arg1: i32) -> (i32, i32) {
    %c0_i32 = arith.constant 0 : i32
    %c0_i32_0 = arith.constant 0 : i32
    %c0_i32_1 = arith.constant 0 : i32
    return %c0_i32, %c0_i32_0 : i32, i32
  }
  func.func @transform_2(%arg0: i32, %arg1: i32) -> (i32, i32) {
    %c0_i32 = arith.constant 0 : i32
    %c0_i32_0 = arith.constant 0 : i32
    %c0_i32_1 = arith.constant 0 : i32
    return %c0_i32, %c0_i32_0 : i32, i32
  }
  func.func @transform_3(%arg0: i32, %arg1: i32) -> (i32, i32) {
    %c0_i32 = arith.constant 0 : i32
    %c0_i32_0 = arith.constant 0 : i32
    %c0_i32_1 = arith.constant 0 : i32
    return %c0_i32, %c0_i32_0 : i32, i32
  }
  func.func @transform_4(%arg0: i32, %arg1: i32) -> (i32, i32) {
    %c0_i32 = arith.constant 0 : i32
    %c0_i32_0 = arith.constant 0 : i32
    %c0_i32_1 = arith.constant 0 : i32
    return %c0_i32, %c0_i32_0 : i32, i32
  }
  func.func @transform_5(%arg0: i32, %arg1: i32) -> (i32, i32) {
    %c0_i32 = arith.constant 0 : i32
    %c0_i32_0 = arith.constant 0 : i32
    %c0_i32_1 = arith.constant 0 : i32
    return %c0_i32, %c0_i32_0 : i32, i32
  }
  func.func @transform_6(%arg0: i32, %arg1: i32) -> (i32, i32, i32) {
    %c0_i32 = arith.constant 0 : i32
    %c0_i32_0 = arith.constant 0 : i32
    return %arg0, %c0_i32, %arg1 : i32, i32, i32
  }
}

</mosaic_0001>

<bundles_post_ra>
// kernel: tpu_custom_call.1
= control target key start
LH: loop header
LB: loop body
LE: loop exit
PB: predicated region body
PF: predicated region fallthrough
CT: control target
= control target key end

     0   :  { %s2422_s0 = inlined_call_operand.hbm [shape: f32[2,16,256], index: 0, kind: input, shape index: {}]   ;;  %s2423_s1 = inlined_call_operand.vmem [shape: bf16[16,16], index: 1, kind: input, shape index: {}]   ;;  %s2424_s2 = inlined_call_operand.vmem [shape: f32[16,1], index: 2, kind: input, shape index: {}]   ;;  %s2425_s3 = inlined_call_operand.vmem [shape: bf16[16,16], index: 3, kind: input, shape index: {}]   ;;  %s2426_s4 = inlined_call_operand.vmem [shape: f32[16,1], index: 4, kind: input, shape index: {}]   ;;  %s2427_s5 = inlined_call_operand.<no memory space> [shape: f32[1,1], index: 5, kind: input, shape index: {}]   ;;  %s2428_s6 = inlined_call_operand.hbm [shape: f32[2,16,256], index: 6, kind: output, shape index: {}]  }
   0x1   :  { %11 = sst [smem:[#allocation4]] %s2427_s5 }
   0x2   :  { %12 = vsyncpa [#allocation6], 0 }
   0x3   :  { %14 = vsyncpa [#allocation6 + $0x1], 0 }
   0x4   :  { %15 = vsyncpa [#allocation7], 0 }
   0x5   :  { %17 = vsyncpa [#allocation7 + $0x1], 0  ;;  %s1704_s23 = smov 0   ;;  %s1706_s24 = smov 0  }
   0x6   :  { %s1708_s25 = smov 0   ;;  %s1710_s26 = smov 0  }
   0x7   :  { %s1712_s27 = smov 0   ;;  %s1714_s28 = smov 0  }
   0x8 LB: > { %s1256_s5 = sadd.s32 4294967295, %s1659_s28   ;;  %s1257_s29 = sadd.s32 4294967294, %s1659_s28   ;;  %s1659_s28 = sphi %s1714_s28, %s23_s28   ;;  %s1655_s27 = sphi %s1712_s27, %s2492_s27   ;;  %s1651_s26 = sphi %s1710_s26, %s2491_s26   ;;  %s1647_s25 = sphi %s1708_s25, %s2490_s25   ;;  %s1643_s24 = sphi %s1706_s24, %s2489_s24   ;;  %s1639_s23 = sphi %s1704_s23, %s2488_s23  }
   0x9   : > { %s35_s30 = sadd.s32 1, %s1655_s27  ;;  %s42_s7 = sadd.s32 1, %s1647_s25 }
   0xa   : > { %p37_p0 = scmp.ge.s32.totalorder %s35_s30, 2  ;;  %p49_p1 = scmp.ne.s32.totalorder %s1647_s25, %s1643_s24 }
   0xb   : > { %p50_p2 = scmp.eq.s32.totalorder %s1659_s28, 0  ;;  %p55_p3 = scmp.ne.s32.totalorder %s1643_s24, %s1639_s23 }
   0xc   : > { %s2494_s30 = smov (%p37_p0, %s35_s30), 0  ;;  %p56_p5 = scmp.eq.s32.totalorder %s1256_s5, 0 }
   0xd   : > { %p1745_p4 = por %p50_p2, %p49_p1  ;;  %s39_s9 = ssub.s32 %s1655_s27, %s2494_s30 }
   0xe   : > { %p186_p6 = scmp.eq.s32.totalorder %s1256_s5, 1  ;;  %p40_p7 = scmp.eq.s32.totalorder %s39_s9, 0 }
   0xf   : > { %p1751_p8 = por %p56_p5, %p55_p3  ;;  %p192_p10 = scmp.eq.s32.totalorder %s1257_s29, 1 }
  0x10   : > { %p1755_p9 = por %p186_p6, %p49_p1  ;;  %p1259_p12 = scmp.ge.s32.totalorder %s1659_s28, 2 }
  0x11   : > { %s1760_s12 = scalar_select %p40_p7, %s1647_s25, %s42_s7  }
  0x12   : > { %p1762_p11 = por %p192_p10, %p55_p3  ;;  %p1353_p13 = scmp.lt.s32.totalorder %s1659_s28, 2 }
  0x13   : > { %s227_s14 = sand.u32 1, %s1647_s25   ;;  %s1331_s16 = sshll.u32 %s1655_s27, 5 }
  0x14   : > { %s1260_s15 = sshll.u32 %s227_s14, 5  ;;  %s236_s19 = scalar_lea.hbm %s2422_s0, %s1331_s16 }
  0x15   : > { %s231_s20 = scalar_lea.vmem [#allocation5], %s1260_s15  ;;  %s237_s22 = sshll.u32 %s236_s19, 4  ;;  %s238_s22 = int_to_ptr.hbm [resolvable:$true] %s237_s22 }
  0x16   : > { %s239_s21 = sshll.u32 %s231_s20, 4  ;;  %p1346_p0 = pnand %p1353_p13, %p1745_p4  ;;  %s240_s21 = int_to_ptr.vmem [resolvable:$true] %s239_s21 }
  0x17   : > { %p1263_p1 = scmp.ge.s32.totalorder %s1659_s28, 1  ;;  %s228_s5 = scalar_lea.sflag [#allocation6], %s227_s14 }
  0x18   : > { %s1661_s29 = smov 256   ;;  %s1662_s7 = smov 16  }
  0x19   : > { %1348 = dma.hbm_to_vmem [thread:$0]  (!%p1346_p0), %s238_s22, 512, %s240_s21, %s228_s5, %s1661_s29, %s1661_s29, %s1662_s7  }
  0x1a   : > { %p247_p2 = scmp.lt.s32.totalorder %s1659_s28, 3 }
  0x1c   : > { %p248_p3 = pnand %p1263_p1, %p247_p2 }
  0x1e   : > { %251 = sbr.rel (%p248_p3) target bundleno = 789 (0x315), region = 44 }
  0x23   : > { %s1778_s9 = sand.u32 1, %s1643_s24  }
  0x24   : > { %s1264_s15 = sshll.u32 %s1778_s9, 5  ;;  %s254_s16 = scalar_lea.sflag [#allocation6], %s1778_s9 }
  0x25   : > { %s1784_s8 = scalar_lea.vmem [#allocation5], %s1264_s15 }
  0x26   : > { %1630 = dma.done.wait (%p1751_p8), %s254_s16, 512  }
  0x27   : > { %1632 = vsyncadd (%p1751_p8), %s254_s16, 4294966784  ;;  %v1663_v0 = vmov 0   ;;  %v293_v1 = vld [vmem:[%s1784_s8] sm:$0xff]  ;;  %v294_v2 = vld [vmem:[%s1784_s8 + $0x8] sm:$0xff]  ;;  %vm330_vm0 = vcmask 130048   ;;  %s1138_s14 = sld [smem:[#allocation4]] }
  0x28   : > { %1408 = vset.pattern.permute.xlu0 %v1663_v0  ;;  %1410 = vset.pattern.permute.xlu2 %v1663_v0  ;;  %v295_v3 = vld [vmem:[%s1784_s8 + $0x10] sm:$0xff]  ;;  %v296_v4 = vld [vmem:[%s1784_s8 + $0x18] sm:$0xff]  ;;  %v297_v5 = vpack.c.bf16 %v294_v2, %v293_v1  ;;  %v379_v7 = vld [vmem:[%s2424_s2] sm:$0xff]  ;;  %s2374_s17 = scalar_lea.vmem [#allocation8], %s1264_s15  ;;  %s1338_s15 = sshll.u32 %s1651_s26, 5 }
  0x29   : > { %v375_v6 = vpack.c.bf16 %v295_v3, %v293_v1  ;;  %v298_v8 = vpack.c.bf16 %v296_v4, %v295_v3  ;;  %v376_v9 = vpack.c.bf16 %v296_v4, %v294_v2  ;;  %v1333_v10 = vld [vmem:[%s2423_s1] sm:$0xff]  ;;  %383 = vperm.xlu0 %1408, %v379_v7   ;;  %v380_v17 = vld [vmem:[%s2424_s2 + $0x8] sm:$0xff]  ;;  %s1166_s19 = scalar_lea.hbm %s2428_s6, %s1338_s15  ;;  %s1167_s20 = sshll.u32 %s2374_s17, 4  ;;  %s1168_s20 = int_to_ptr.vmem [resolvable:$true] %s1167_s20 }
  0x2a   : > { %299 = vst [vmem:[#allocation2] sm:$0xff] %v297_v5  ;;  %v322_v11 = vunpack.c.l.b16 %v297_v5  ;;  %v323_v12 = vunpack.c.h.b16 %v297_v5  ;;  %v1332_v24 = vld [vmem:[%s2425_s3] sm:$0xff]  ;;  %v304_v37 = vld [vmem:[%s2426_s4 + $0x8] sm:$0xff]  ;;  %s1169_s21 = sshll.u32 %s1166_s19, 4  ;;  %s1153_s26 = scalar_lea.sflag [#allocation7], %s1778_s9  ;;  %s1170_s21 = int_to_ptr.hbm [resolvable:$true] %s1169_s21 }
  0x2b   : > { %407 = vmatpush.bf16.msra.mxu2 %v375_v6  ;;  %300 = vst [vmem:[#allocation2 + $0x8] sm:$0xff] %v298_v8  ;;  %421 = vmatpush.bf16.msra.mxu3 %v376_v9  ;;  %v324_v13 = vunpack.c.l.b16 %v298_v8  ;;  %v325_v14 = vunpack.c.h.b16 %v298_v8  ;;  %v303_v42 = vld [vmem:[%s2426_s4] sm:$0xff]  ;;  %s1591_s22 = sshra.s32 %s1170_s21, 4  ;;  %s1597_s16 = scalar_lea.hbm %s2428_s6, 64  ;;  %s1592_s22 = int_to_ptr.hbm [resolvable:$true] %s1591_s22 }
  0x2c   : > { %312 = vperm.xlu2 %1410, %v304_v37   ;;  %s1593_s5 = scalar_lea.hbm %s1592_s22, 32  ;;  %p1598_p7 = scmp.lt.s32.totalorder %s1592_s22, %s2428_s6 }
  0x2d   : > { %v326_v15 = vpack.c.b16 %v324_v13, %v322_v11  ;;  %v327_v16 = vpack.c.b16 %v325_v14, %v323_v12  ;;  %p1594_p4 = scmp.ne.s32.totalorder %s1592_s22, %s1593_s5  ;;  %p1599_p8 = scmp.lt.s32.totalorder %s1597_s16, %s1593_s5 }
  0x2e   : > { %1276 = vmatmul.msk.bf16.vlgmr.msra.gmra.mxu2 %vm330_vm0, %v1333_v10  ;;  %1277 = vmatmul.msk.bf16.vlgmr.msra.gmra.mxu3 %vm330_vm0, %v1333_v10 }
  0x2f   : > { %341 = vmatpush.bf16.msra.mxu0 %v326_v15  ;;  %355 = vmatpush.bf16.msra.mxu1 %v327_v16  ;;  %p1595_p5 = pnand %p1594_p4, %p1755_p9  ;;  %p1600_p10 = por %p1599_p8, %p1598_p7 }
  0x31   : > { %v1334_v18 = vld [vmem:[#allocation2 + $0x4] sm:$0xf]  ;;  %v1280_v19 = vld [vmem:[#allocation2] sm:$0xf]  ;;  %388 = vperm.xlu0 %1408, %v380_v17   ;;  %p1596_p6 = pneg %p1595_p5 }
  0x32   : > { %v1282_v20 = vld [vmem:[#allocation2 + $0x8] sm:$0xf0]  ;;  %v1335_v21 = vld [vmem:[#allocation2 + $0x4] sm:$0xf0]  ;;  %1270 = vmatmul.msk.bf16.vlgmr.msra.gmra.mxu0 %vm330_vm0, %v1332_v24  ;;  %1271 = vmatmul.msk.bf16.vlgmr.msra.gmra.mxu1 %vm330_vm0, %v1332_v24 }
  0x33   : > { %v1281_v22 = vor.u32 %v1335_v21, %v1280_v19  ;;  %v1285_v23 = vor.u32 %v1334_v18, %v1282_v20  ;;  %p1601_p13 = pnand %p1600_p10, %p1596_p6 }
  0x35   : > { %442 = vxpose.binary.xlu1.c.b16.start.end [1/2] (short) %v1285_v23, %v1281_v22, 128 }
  0x86   : > { %v313_v53 = vpop.permute.xlu2 %312 }
  0x88   : > { %1409 = vset.pattern.permute.xlu1 %v1663_v0 }
  0x9b   : > { %v384_v25 = vpop.permute.xlu0 %383 }
  0xa3   : > { %v389_v28 = vpop.permute.xlu0 %388 }
  0xaf   : > { %v343_v48 = vpop.f32.mrf.mxu0  ;;  %v357_v49 = vpop.f32.mrf.mxu1 }
  0xb1   : > { %v409_v26 = vpop.f32.mrf.mxu2  ;;  %v423_v27 = vpop.f32.mrf.mxu3 }
  0xb2   : > { %v410_v29 = vadd.f32 %v409_v26, %v384_v25  ;;  %v424_v30 = vadd.f32 %v423_v27, %v384_v25 }
  0xb7   : > { %v345_v51 = vpop.f32.mrf.mxu0  ;;  %v359_v52 = vpop.f32.mrf.mxu1 }
  0xb8   : > { %v346_v54 = vadd.f32 %v345_v51, %v313_v53  ;;  %v360_v55 = vadd.f32 %v359_v52, %v313_v53 }
  0xb9   : > { %v411_v31 = vpop.f32.mrf.mxu2  ;;  %v425_v33 = vpop.f32.mrf.mxu3 }
  0xba   : > { %v412_v32 = vadd.f32 %v411_v31, %v389_v28  ;;  %v426_v34 = vadd.f32 %v425_v33, %v389_v28  ;;  %v363_v56 = vpack.c.bf16 %v360_v55, %v346_v54 }
  0xbc   : > { %v428_v35 = vpack.c.bf16 %v412_v32, %v410_v29  ;;  %v429_v36 = vpack.c.bf16 %v426_v34, %v424_v30  ;;  %365 = vst [vmem:[#allocation3 + $0x8] sm:$0xff] %v363_v56 }
  0xbe   : > { %521 = vmatpush.bf16.msrb.mxu0 %v428_v35  ;;  %1339 = vmatpush.bf16.msrb.mxu2 %v428_v35 }
  0xbf   : > { %610 = vmatpush.bf16.msrb.mxu1 %v429_v36  ;;  %1340 = vmatpush.bf16.msrb.mxu3 %v429_v36 }
  0xe1   : > { %v450_v38 = vpop.trf.xlu1 }
  0xe2   : > { %1286 = vmatmul.msk.bf16.vlgmr.msrb.gmra.mxu0 %vm330_vm0, %v450_v38  ;;  %1302 = vmatmul.msk.bf16.vlgmr.msrb.gmra.mxu1 %vm330_vm0, %v450_v38 }
  0xe9   : > { %v451_v39 = vpop.trf.xlu1 }
  0xf1   : > { %v452_v40 = vpop.trf.xlu1 }
  0xf2   : > { %1287 = vmatmul.msk.bf16.gmra.mxu0 %vm330_vm0, %v452_v40  ;;  %1303 = vmatmul.msk.bf16.gmra.mxu1 %vm330_vm0, %v452_v40 }
  0xf9   : > { %v453_v41 = vpop.trf.xlu1 }
  0xff   : > { %307 = vperm.xlu1 %1409, %v303_v42  }
 0x101   : > { %v454_v43 = vpop.trf.xlu1 }
 0x102   : > { %1288 = vmatmul.msk.bf16.gmra.mxu0 %vm330_vm0, %v454_v43  ;;  %1304 = vmatmul.msk.bf16.gmra.mxu1 %vm330_vm0, %v454_v43 }
 0x109   : > { %v455_v44 = vpop.trf.xlu1 }
 0x10a   : > { %1296 = vmatmul.msk.bf16.vlgmr.msrb.gmra.mxu2 %vm330_vm0, %v455_v44  ;;  %1312 = vmatmul.msk.bf16.vlgmr.msrb.gmra.mxu3 %vm330_vm0, %v455_v44 }
 0x111   : > { %v456_v45 = vpop.trf.xlu1 }
 0x112   : > { %1289 = vmatmul.msk.bf16.gmra.mxu0 %vm330_vm0, %v456_v45  ;;  %1305 = vmatmul.msk.bf16.gmra.mxu1 %vm330_vm0, %v456_v45 }
 0x119   : > { %v457_v46 = vpop.trf.xlu1 }
 0x11a   : > { %1297 = vmatmul.msk.bf16.gmra.mxu2 %vm330_vm0, %v457_v46  ;;  %1313 = vmatmul.msk.bf16.gmra.mxu3 %vm330_vm0, %v457_v46 }
 0x121   : > { %v458_v47 = vpop.trf.xlu1 }
 0x122   : > { %1290 = vmatmul.msk.bf16.gmra.mxu0 %vm330_vm0, %v458_v47  ;;  %1306 = vmatmul.msk.bf16.gmra.mxu1 %vm330_vm0, %v458_v47 }
 0x129   : > { %v459_v50 = vpop.trf.xlu1 }
 0x12a   : > { %1298 = vmatmul.msk.bf16.gmra.mxu2 %vm330_vm0, %v459_v50  ;;  %1314 = vmatmul.msk.bf16.gmra.mxu3 %vm330_vm0, %v459_v50 }
 0x131   : > { %v460_v57 = vpop.trf.xlu1 }
 0x132   : > { %1291 = vmatmul.msk.bf16.gmra.mxu0 %vm330_vm0, %v460_v57  ;;  %1307 = vmatmul.msk.bf16.gmra.mxu1 %vm330_vm0, %v460_v57 }
 0x139   : > { %v461_v58 = vpop.trf.xlu1 }
 0x13a   : > { %1299 = vmatmul.msk.bf16.gmra.mxu2 %vm330_vm0, %v461_v58  ;;  %1315 = vmatmul.msk.bf16.gmra.mxu3 %vm330_vm0, %v461_v58 }
 0x141   : > { %v462_v59 = vpop.trf.xlu1 }
 0x142   : > { %1292 = vmatmul.msk.bf16.gmra.mxu0 %vm330_vm0, %v462_v59  ;;  %1308 = vmatmul.msk.bf16.gmra.mxu1 %vm330_vm0, %v462_v59 }
 0x149   : > { %v463_v60 = vpop.trf.xlu1 }
 0x14a   : > { %1300 = vmatmul.msk.bf16.gmra.mxu2 %vm330_vm0, %v463_v60  ;;  %1316 = vmatmul.msk.bf16.gmra.mxu3 %vm330_vm0, %v463_v60 }
 0x151   : > { %v464_v61 = vpop.trf.xlu1 }
 0x152   : > { %1293 = vmatmul.msk.bf16.gmra.mxu0 %vm330_vm0, %v464_v61  ;;  %1309 = vmatmul.msk.bf16.gmra.mxu1 %vm330_vm0, %v464_v61 }
 0x159   : > { %v465_v62 = vpop.trf.xlu1 }
 0x15a   : > { %1301 = vmatmul.msk.bf16.gmra.mxu2 %vm330_vm0, %v465_v62  ;;  %1317 = vmatmul.msk.bf16.gmra.mxu3 %vm330_vm0, %v465_v62 }
 0x15f   : > { %v1844_v63 = vpop.f32.mrf.mxu0  ;;  %v1846_v0 = vpop.f32.mrf.mxu1 }
 0x160   : > { %2451 = vst [vmem:[#allocation11_spill] sm:$0xff] %v1846_v0 }
 0x162   : > { %1294 = vmatmul.msk.bf16.gmra.mxu0 %vm330_vm0, %v451_v39  ;;  %1310 = vmatmul.msk.bf16.gmra.mxu1 %vm330_vm0, %v451_v39 }
 0x167   : > { %v1850_v1 = vpop.f32.mrf.mxu0  ;;  %v1852_v2 = vpop.f32.mrf.mxu1 }
 0x168   : > { %2452 = vst [vmem:[#allocation12_spill] sm:$0xff] %v1852_v2 }
 0x16f   : > { %v1854_v3 = vpop.f32.mrf.mxu0  ;;  %v1856_v4 = vpop.f32.mrf.mxu1 }
 0x170   : > { %2453 = vst [vmem:[#allocation13_spill] sm:$0xff] %v1856_v4  ;;  %v692_v51 = vmax.f32 %v1844_v63, %v1854_v3 }
 0x171   : > { %v308_v5 = vpop.permute.xlu1 %307 }
 0x172   : > { %v344_v6 = vadd.f32 %v343_v48, %v308_v5  ;;  %v358_v7 = vadd.f32 %v357_v49, %v308_v5  ;;  %1295 = vmatmul.msk.bf16.gmra.mxu0 %vm330_vm0, %v453_v41  ;;  %1311 = vmatmul.msk.bf16.gmra.mxu1 %vm330_vm0, %v453_v41 }
 0x174   : > { %v362_v8 = vpack.c.bf16 %v358_v7, %v344_v6 }
 0x176   : > { %364 = vst [vmem:[#allocation3] sm:$0xff] %v362_v8 }
 0x177   : > { %v1860_v9 = vpop.f32.mrf.mxu0  ;;  %v1862_v10 = vpop.f32.mrf.mxu1 }
 0x178   : > { %2454 = vst [vmem:[#allocation14_spill] sm:$0xff] %v1862_v10  ;;  %v693_v59 = vmax.f32 %v1850_v1, %v1860_v9  ;;  %v730_v7 = vmax.f32 %v1852_v2, %v1862_v10 }
 0x17f   : > { %v1864_v11 = vpop.f32.mrf.mxu0  ;;  %v1866_v12 = vpop.f32.mrf.mxu1 }
 0x180   : > { %2455 = vst [vmem:[#allocation15_spill] sm:$0xff] %v1866_v12  ;;  %v694_v52 = vmax.f32 %v692_v51, %v1864_v11 }
 0x187   : > { %v1868_v13 = vpop.f32.mrf.mxu0  ;;  %v1870_v14 = vpop.f32.mrf.mxu1 }
 0x188   : > { %2456 = vst [vmem:[#allocation16_spill] sm:$0xff] %v1870_v14  ;;  %v695_v61 = vmax.f32 %v693_v59, %v1868_v13  ;;  %v732_v59 = vmax.f32 %v730_v7, %v1870_v14 }
 0x18d   : > { %v1876_v17 = vpop.f32.mrf.mxu2  ;;  %v1892_v25 = vpop.f32.mrf.mxu3 }
 0x18f   : > { %v1872_v15 = vpop.f32.mrf.mxu0  ;;  %v1874_v16 = vpop.f32.mrf.mxu1 }
 0x190   : > { %v696_v53 = vmax.f32 %v694_v52, %v1872_v15 }
 0x195   : > { %v1886_v22 = vpop.f32.mrf.mxu2  ;;  %v1900_v29 = vpop.f32.mrf.mxu3 }
 0x196   : > { %2457 = vst [vmem:[#allocation17_spill] sm:$0xff] %v1900_v29 }
 0x197   : > { %v1878_v18 = vpop.f32.mrf.mxu0  ;;  %v1880_v19 = vpop.f32.mrf.mxu1 }
 0x198   : > { %v697_v5 = vmax.f32 %v695_v61, %v1878_v18 }
 0x19d   : > { %v1894_v26 = vpop.f32.mrf.mxu2  ;;  %v1908_v33 = vpop.f32.mrf.mxu3 }
 0x19f   : > { %v1882_v20 = vpop.f32.mrf.mxu0  ;;  %v1884_v21 = vpop.f32.mrf.mxu1 }
 0x1a0   : > { %v698_v55 = vmax.f32 %v696_v53, %v1882_v20 }
 0x1a5   : > { %v1902_v30 = vpop.f32.mrf.mxu2  ;;  %v1916_v37 = vpop.f32.mrf.mxu3 }
 0x1a7   : > { %v1888_v23 = vpop.f32.mrf.mxu0  ;;  %v1890_v24 = vpop.f32.mrf.mxu1 }
 0x1a8   : > { %v699_v8 = vmax.f32 %v697_v5, %v1888_v23 }
 0x1ad   : > { %v1910_v34 = vpop.f32.mrf.mxu2  ;;  %v1928_v43 = vpop.f32.mrf.mxu3 }
 0x1af   : > { %v1896_v27 = vpop.f32.mrf.mxu0  ;;  %v1898_v28 = vpop.f32.mrf.mxu1 }
 0x1b0   : > { %v700_v60 = vmax.f32 %v698_v55, %v1896_v27  ;;  %v729_v55 = vmax.f32 %v1846_v0, %v1856_v4 }
 0x1b2   : > { %v731_v5 = vmax.f32 %v729_v55, %v1866_v12 }
 0x1b4   : > { %v733_v4 = vmax.f32 %v731_v5, %v1874_v16 }
 0x1b5   : > { %v1922_v40 = vpop.f32.mrf.mxu2  ;;  %v1936_v47 = vpop.f32.mrf.mxu3 }
 0x1b6   : > { %v735_v14 = vmax.f32 %v733_v4, %v1884_v21 }
 0x1b7   : > { %v1904_v31 = vpop.f32.mrf.mxu0  ;;  %v1906_v32 = vpop.f32.mrf.mxu1 }
 0x1b8   : > { %2458 = vst [vmem:[#allocation18_spill] sm:$0xff] %v1906_v32 }
 0x1bd   : > { %v1930_v44 = vpop.f32.mrf.mxu2  ;;  %v1948_v54 = vpop.f32.mrf.mxu3 }
 0x1bf   : > { %v1912_v35 = vpop.f32.mrf.mxu0  ;;  %v1914_v36 = vpop.f32.mrf.mxu1 }
 0x1c0   : > { %v702_v62 = vmax.f32 %v700_v60, %v1912_v35  ;;  %v701_v60 = vmax.f32 %v699_v8, %v1904_v31 }
 0x1c5   : > { %v1938_v48 = vpop.f32.mrf.mxu2  ;;  %v1968_v52 = vpop.f32.mrf.mxu3 }
 0x1c7   : > { %v1918_v38 = vpop.f32.mrf.mxu0  ;;  %v1920_v39 = vpop.f32.mrf.mxu1 }
 0x1c8   : > { %2459 = vst [vmem:[#allocation19_spill] sm:$0xff] %v1920_v39  ;;  %v703_v2 = vmax.f32 %v701_v60, %v1918_v38 }
 0x1cd   : > { %v1951_v56 = vpop.f32.mrf.mxu2 }
 0x1cf   : > { %v1924_v41 = vpop.f32.mrf.mxu0  ;;  %v1926_v42 = vpop.f32.mrf.mxu1 }
 0x1d0   : > { %v704_v6 = vmax.f32 %v702_v62, %v1924_v41 }
 0x1d5   : > { %v1977_v62 = vpop.f32.mrf.mxu2 }
 0x1d7   : > { %v1932_v45 = vpop.f32.mrf.mxu0  ;;  %v1934_v46 = vpop.f32.mrf.mxu1 }
 0x1d8   : > { %2460 = vst [vmem:[#allocation20_spill] sm:$0xff] %v1934_v46  ;;  %v705_v8 = vmax.f32 %v703_v2, %v1932_v45 }
 0x1dd   : > { %v2000_v2 = vpop.f32.mrf.mxu2 }
 0x1df   : > { %v1940_v49 = vpop.f32.mrf.mxu0  ;;  %v1942_v50 = vpop.f32.mrf.mxu1 }
 0x1e0   : > { %2461 = vst [vmem:[#allocation21_spill] sm:$0xff] %v1940_v49  ;;  %v706_v51 = vmax.f32 %v704_v6, %v1940_v49  ;;  %v734_v6 = vmax.f32 %v732_v59, %v1880_v19  ;;  %v737_v59 = vmax.f32 %v735_v14, %v1898_v28 }
 0x1e1   : > { %2462 = vst [vmem:[#allocation22_spill] sm:$0xff] %v1942_v50 }
 0x1e2   : > { %v736_v7 = vmax.f32 %v734_v6, %v1890_v24  ;;  %v1998_v6 = vpop.f32.mrf.mxu3  ;;  %v739_v4 = vmax.f32 %v737_v59, %v1914_v36 }
 0x1e4   : > { %v738_v0 = vmax.f32 %v736_v7, %v1906_v32  ;;  %v741_v14 = vmax.f32 %v739_v4, %v1926_v42 }
 0x1e6   : > { %v740_v60 = vmax.f32 %v738_v0, %v1920_v39  ;;  %v743_v39 = vmax.f32 %v741_v14, %v1942_v50 }
 0x1e7   : > { %v1953_v57 = vpop.f32.mrf.mxu0  ;;  %v1955_v58 = vpop.f32.mrf.mxu1 }
 0x1e8   : > { %2463 = vst [vmem:[#allocation23_spill] sm:$0xff] %v1955_v58  ;;  %v707_v55 = vmax.f32 %v705_v8, %v1953_v57 }
 0x1ef   : > { %v1970_v53 = vpop.f32.mrf.mxu0  ;;  %v1979_v10 = vpop.f32.mrf.mxu1 }
 0x1f0   : > { %v708_v61 = vmax.f32 %v706_v51, %v1970_v53  ;;  %2464 = vst [vmem:[#allocation24_spill] sm:$0xff] %v1979_v10 }
 0x1f2   : > { %v710_v49 = vmax.f32 %v708_v61, %v1876_v17 }
 0x1f4   : > { %v712_v51 = vmax.f32 %v710_v49, %v1894_v26  ;;  %v742_v49 = vmax.f32 %v740_v60, %v1934_v46  ;;  %v745_v60 = vmax.f32 %v743_v39, %v1979_v10 }
 0x1f6   : > { %v714_v61 = vmax.f32 %v712_v51, %v1910_v34  ;;  %v744_v0 = vmax.f32 %v742_v49, %v1955_v58  ;;  %v2019_v58 = vpop.f32.mrf.mxu3 }
 0x1f7   : > { %v1992_v12 = vpop.f32.mrf.mxu0  ;;  %v2005_v8 = vpop.f32.mrf.mxu1 }
 0x1f8   : > { %v709_v5 = vmax.f32 %v707_v55, %v1992_v12  ;;  %2465 = vst [vmem:[#allocation25_spill] sm:$0xff] %v2005_v8  ;;  %v716_v51 = vmax.f32 %v714_v61, %v1930_v44  ;;  %v746_v59 = vmax.f32 %v744_v0, %v2005_v8  ;;  %v2021_v61 = vpop.f32.mrf.mxu2 }
 0x1fa   : > { %v711_v7 = vmax.f32 %v709_v5, %v1886_v22  ;;  %v718_v5 = vmax.f32 %v716_v51, %v1951_v56  ;;  %v748_v4 = vmax.f32 %v746_v59, %v1900_v29 }
 0x1fc   : > { %v713_v55 = vmax.f32 %v711_v7, %v1902_v30  ;;  %v747_v7 = vmax.f32 %v745_v60, %v1892_v25  ;;  %v720_v14 = vmax.f32 %v718_v5, %v2000_v2  ;;  %v750_v39 = vmax.f32 %v748_v4, %v1916_v37 }
 0x1fe   : > { %v715_v32 = vmax.f32 %v713_v55, %v1922_v40  ;;  %v749_v51 = vmax.f32 %v747_v7, %v1908_v33  ;;  %v752_v59 = vmax.f32 %v750_v39, %v1936_v47 }
 0x200   : > { %v717_v46 = vmax.f32 %v715_v32, %v1938_v48  ;;  %v751_v8 = vmax.f32 %v749_v51, %v1928_v43  ;;  %v754_v60 = vmax.f32 %v752_v59, %v1968_v52 }
 0x202   : > { %v719_v49 = vmax.f32 %v717_v46, %v1977_v62  ;;  %v2029_v46 = vpop.f32.mrf.mxu3  ;;  %v753_v5 = vmax.f32 %v751_v8, %v1948_v54  ;;  %v756_v4 = vmax.f32 %v754_v60, %v2019_v58 }
 0x204   : > { %v721_v0 = vmax.f32 %v719_v49, %v2021_v61 }
 0x206   : > { %v722_v55 = vmax.f32 %v720_v14, %v721_v0  ;;  %v755_v14 = vmax.f32 %v753_v5, %v1998_v6 }
 0x208   : > { %v723_v32 = vrot.slane %v722_v55, 4 }
 0x20a   : > { %v724_v29 = vmax.f32 %v722_v55, %v723_v32  ;;  %v2038_v0 = vpop.f32.mrf.mxu3  ;;  %v757_v55 = vmax.f32 %v755_v14, %v2029_v46 }
 0x20b   : > { %v758_v39 = vmax.f32 %v756_v4, %v2038_v0 }
 0x20c   : > { %v725_v10 = vrot.slane %v724_v29, 2 }
 0x20d   : > { %v759_v51 = vmax.f32 %v757_v55, %v758_v39 }
 0x20e   : > { %v726_v50 = vmax.f32 %v724_v29, %v725_v10 }
 0x210   : > { %v727_v49 = vrot.slane %v726_v50, 1 }
 0x212   : > { %v2036_v7 = vmax.f32 %v726_v50, %v727_v49  ;;  %v760_v49 = vrot.slane %v759_v51, 4 }
 0x214   : > { %v766_v10 = vsub.f32 %v1844_v63, %v2036_v7  ;;  %v768_v29 = vsub.f32 %v1850_v1, %v2036_v7  ;;  %v770_v8 = vsub.f32 %v1854_v3, %v2036_v7  ;;  %v772_v50 = vsub.f32 %v1860_v9, %v2036_v7 }
 0x215   : > { %v774_v60 = vsub.f32 %v1864_v11, %v2036_v7  ;;  %v776_v63 = vsub.f32 %v1868_v13, %v2036_v7  ;;  %v778_v3 = vsub.f32 %v1872_v15, %v2036_v7  ;;  %v761_v14 = vmax.f32 %v759_v51, %v760_v49 }
 0x216   : > { %v830_v32 = vmul.f32 1.442695, %v766_v10  ;;  %v834_v59 = vmul.f32 1.442695, %v768_v29  ;;  %v838_v5 = vmul.f32 1.442695, %v770_v8  ;;  %v780_v9 = vsub.f32 %v1878_v18, %v2036_v7 }
 0x217   : > { %v842_v1 = vmul.f32 1.442695, %v772_v50  ;;  %v846_v4 = vmul.f32 1.442695, %v774_v60  ;;  %v850_v39 = vmul.f32 1.442695, %v776_v63  ;;  %v782_v55 = vsub.f32 %v1882_v20, %v2036_v7 }
 0x218   : > { %1411 = vpow2.f32 %v830_v32  ;;  %v784_v13 = vsub.f32 %v1888_v23, %v2036_v7  ;;  %v854_v15 = vmul.f32 1.442695, %v778_v3  ;;  %v786_v29 = vsub.f32 %v1896_v27, %v2036_v7 }
 0x219   : > { %1413 = vpow2.f32 %v834_v59  ;;  %v762_v8 = vrot.slane %v761_v14, 2  ;;  %v788_v50 = vsub.f32 %v1904_v31, %v2036_v7  ;;  %v858_v20 = vmul.f32 1.442695, %v780_v9  ;;  %v2466_v9 = vld [vmem:[#allocation21_spill] sm:$0xff] }
 0x21a   : > { %1415 = vpow2.f32 %v838_v5  ;;  %v790_v32 = vsub.f32 %v1912_v35, %v2036_v7  ;;  %v862_v23 = vmul.f32 1.442695, %v782_v55  ;;  %v792_v27 = vsub.f32 %v1918_v38, %v2036_v7 }
 0x21b   : > { %1417 = vpow2.f32 %v842_v1  ;;  %v866_v5 = vmul.f32 1.442695, %v784_v13  ;;  %v794_v49 = vsub.f32 %v1924_v41, %v2036_v7  ;;  %v870_v63 = vmul.f32 1.442695, %v786_v29 }
 0x21c   : > { %1419 = vpow2.f32 %v846_v4  ;;  %v763_v1 = vmax.f32 %v761_v14, %v762_v8  ;;  %v796_v35 = vsub.f32 %v1932_v45, %v2036_v7  ;;  %v874_v4 = vmul.f32 1.442695, %v788_v50 }
 0x21d   : > { %1421 = vpow2.f32 %v850_v39  ;;  %v798_v39 = vsub.f32 %v2466_v9, %v2036_v7  ;;  %v878_v38 = vmul.f32 1.442695, %v790_v32  ;;  %v800_v41 = vsub.f32 %v1953_v57, %v2036_v7 }
 0x21e   : > { %v2058_v11 = vpop.eup %1411  ;;  %1423 = vpow2.f32 %v854_v15  ;;  %v802_v14 = vsub.f32 %v1970_v53, %v2036_v7  ;;  %v882_v15 = vmul.f32 1.442695, %v792_v27  ;;  %v886_v45 = vmul.f32 1.442695, %v794_v49 }
 0x21f   : > { %v2062_v10 = vpop.eup %1413  ;;  %1425 = vpow2.f32 %v858_v20  ;;  %v804_v50 = vsub.f32 %v1992_v12, %v2036_v7  ;;  %v890_v20 = vmul.f32 1.442695, %v796_v35  ;;  %v806_v57 = vsub.f32 %v1876_v17, %v2036_v7 }
 0x220   : > { %v958_v18 = vadd.f32 %v2062_v10, %v2058_v11  ;;  %v2070_v51 = vpop.eup %1415  ;;  %1427 = vpow2.f32 %v862_v23  ;;  %v894_v32 = vmul.f32 1.442695, %v798_v39  ;;  %v810_v27 = vsub.f32 %v1894_v26, %v2036_v7 }
 0x221   : > { %v2077_v60 = vpop.eup %1417  ;;  %1429 = vpow2.f32 %v866_v5  ;;  %v898_v5 = vmul.f32 1.442695, %v800_v41  ;;  %v902_v49 = vmul.f32 1.442695, %v802_v14  ;;  %v822_v35 = vsub.f32 %v1951_v56, %v2036_v7 }
 0x222   : > { %v959_v59 = vadd.f32 %v2070_v51, %v958_v18  ;;  %v2084_v3 = vpop.eup %1419  ;;  %1431 = vpow2.f32 %v870_v63  ;;  %v764_v18 = vrot.slane %v763_v1, 1  ;;  %v826_v26 = vsub.f32 %v2000_v2, %v2036_v7 }
 0x223   : > { %v2091_v13 = vpop.eup %1421  ;;  %1433 = vpow2.f32 %v874_v4  ;;  %v910_v9 = vmul.f32 1.442695, %v806_v57  ;;  %v918_v56 = vmul.f32 1.442695, %v810_v27  ;;  %v2469_v27 = vld [vmem:[#allocation13_spill] sm:$0xff] }
 0x224   : > { %v960_v31 = vadd.f32 %v2077_v60, %v959_v59  ;;  %v2098_v8 = vpop.eup %1423  ;;  %1435 = vpow2.f32 %v878_v38  ;;  %v808_v59 = vsub.f32 %v1886_v22, %v2036_v7  ;;  %v2114_v63 = vmax.f32 %v763_v1, %v764_v18  ;;  %v2468_v18 = vld [vmem:[#allocation12_spill] sm:$0xff] }
 0x225   : > { %v2105_v23 = vpop.eup %1425  ;;  %1437 = vpow2.f32 %v882_v15  ;;  %v906_v22 = vmul.f32 1.442695, %v804_v50  ;;  %v828_v1 = vsub.f32 %v2021_v61, %v2036_v7  ;;  %v2467_v15 = vld [vmem:[#allocation11_spill] sm:$0xff]  ;;  %v824_v61 = vsub.f32 %v1977_v62, %v2036_v7 }
 0x226   : > { %v961_v55 = vadd.f32 %v2084_v3, %v960_v31  ;;  %v2111_v12 = vpop.eup %1427  ;;  %1439 = vpow2.f32 %v886_v45  ;;  %v767_v2 = vsub.f32 %v2467_v15, %v2114_v63  ;;  %v769_v50 = vsub.f32 %v2468_v18, %v2114_v63  ;;  %v2471_v15 = vld [vmem:[#allocation15_spill] sm:$0xff] }
 0x227   : > { %v2116_v31 = vpop.eup %1429  ;;  %1441 = vpow2.f32 %v890_v20  ;;  %v950_v57 = vmul.f32 1.442695, %v826_v26  ;;  %v2470_v26 = vld [vmem:[#allocation14_spill] sm:$0xff] }
 0x228   : > { %v962_v29 = vadd.f32 %v2091_v13, %v961_v55  ;;  %v2120_v4 = vpop.eup %1431  ;;  %1443 = vpow2.f32 %v894_v32  ;;  %v914_v55 = vmul.f32 1.442695, %v808_v59  ;;  %v954_v59 = vmul.f32 1.442695, %v828_v1 }
 0x229   : > { %v2125_v38 = vpop.eup %1433  ;;  %1445 = vpow2.f32 %v898_v5  ;;  %v771_v5 = vsub.f32 %v2469_v27, %v2114_v63  ;;  %v832_v62 = vmul.f32 1.442695, %v767_v2  ;;  %v775_v2 = vsub.f32 %v2471_v15, %v2114_v63 }
 0x22a   : > { %v963_v53 = vadd.f32 %v2098_v8, %v962_v29  ;;  %v2129_v41 = vpop.eup %1435  ;;  %1447 = vpow2.f32 %v902_v49  ;;  %v942_v29 = vmul.f32 1.442695, %v822_v35 }
 0x22b   : > { %v2134_v45 = vpop.eup %1437  ;;  %1449 = vpow2.f32 %v906_v22 }
 0x22c   : > { %v964_v17 = vadd.f32 %v2105_v23, %v963_v53  ;;  %v2138_v20 = vpop.eup %1439  ;;  %1451 = vpow2.f32 %v910_v9  ;;  %v773_v9 = vsub.f32 %v2470_v26, %v2114_v63 }
 0x22d   : > { %v2143_v53 = vpop.eup %1441  ;;  %1453 = vpow2.f32 %v914_v55  ;;  %v820_v55 = vsub.f32 %v1938_v48, %v2036_v7 }
 0x22e   : > { %v965_v39 = vadd.f32 %v2111_v12, %v964_v17  ;;  %v2147_v49 = vpop.eup %1443  ;;  %v818_v17 = vsub.f32 %v1930_v44, %v2036_v7  ;;  %1455 = vpow2.f32 %v918_v56 }
 0x22f   : > { %v2152_v22 = vpop.eup %1445  ;;  %1457 = vpow2.f32 %v942_v29  ;;  %v840_v29 = vmul.f32 1.442695, %v771_v5  ;;  %v816_v5 = vsub.f32 %v1922_v40, %v2036_v7  ;;  %v938_v26 = vmul.f32 1.442695, %v820_v55 }
 0x230   : > { %v966_v14 = vadd.f32 %v2116_v31, %v965_v39  ;;  %v836_v39 = vmul.f32 1.442695, %v769_v50  ;;  %v2156_v1 = vpop.eup %1447  ;;  %1459 = vpow2.f32 %v950_v57  ;;  %v814_v50 = vsub.f32 %v1910_v34, %v2036_v7 }
 0x231   : > { %v2161_v56 = vpop.eup %1449  ;;  %1461 = vpow2.f32 %v954_v59  ;;  %v844_v59 = vmul.f32 1.442695, %v773_v9  ;;  %v812_v9 = vsub.f32 %v1902_v30, %v2036_v7  ;;  %v1048_v30 = vpack.c.bf16 %v2143_v53, %v2138_v20 }
 0x232   : > { %v967_v32 = vadd.f32 %v2120_v4, %v966_v14  ;;  %v946_v14 = vmul.f32 1.442695, %v824_v61  ;;  %v2165_v18 = vpop.eup %1451  ;;  %1463 = vpow2.f32 %v832_v62  ;;  %v2472_v61 = vld [vmem:[#allocation16_spill] sm:$0xff]  ;;  %v779_v62 = vsub.f32 %v1874_v16, %v2114_v63 }
 0x233   : > { %v2170_v48 = vpop.eup %1453  ;;  %v777_v57 = vsub.f32 %v2472_v61, %v2114_v63  ;;  %1465 = vpow2.f32 %v836_v39  ;;  %v926_v39 = vmul.f32 1.442695, %v814_v50  ;;  %v930_v16 = vmul.f32 1.442695, %v816_v5  ;;  %1076 = vmatpush.bf16.msra.mxu2 %v1048_v30  ;;  %v2480_v30 = vld [vmem:[#allocation23_spill] sm:$0xff] }
 0x234   : > { %v968_v35 = vadd.f32 %v2125_v38, %v967_v32  ;;  %v934_v32 = vmul.f32 1.442695, %v818_v17  ;;  %1467 = vpow2.f32 %v946_v14  ;;  %v781_v14 = vsub.f32 %v1880_v19, %v2114_v63 }
 0x235   : > { %1469 = vpow2.f32 %v840_v29  ;;  %v783_v29 = vsub.f32 %v1884_v21, %v2114_v63  ;;  %v856_v50 = vmul.f32 1.442695, %v779_v62  ;;  %v785_v21 = vsub.f32 %v1890_v24, %v2114_v63 }
 0x236   : > { %v969_v44 = vadd.f32 %v2129_v41, %v968_v35  ;;  %v2174_v35 = vpop.eup %1455  ;;  %1471 = vpow2.f32 %v934_v32 }
 0x237   : > { %v2179_v17 = vpop.eup %1457  ;;  %1473 = vpow2.f32 %v844_v59  ;;  %v864_v24 = vmul.f32 1.442695, %v783_v29 }
 0x238   : > { %v970_v27 = vadd.f32 %v2134_v45, %v969_v44  ;;  %v848_v44 = vmul.f32 1.442695, %v775_v2  ;;  %v2183_v15 = vpop.eup %1459  ;;  %1475 = vpow2.f32 %v938_v26 }
 0x239   : > { %v2188_v55 = vpop.eup %1461 }
 0x23a   : > { %v971_v34 = vadd.f32 %v2138_v20, %v970_v27  ;;  %v852_v27 = vmul.f32 1.442695, %v777_v57  ;;  %v2192_v61 = vpop.eup %1463  ;;  %1477 = vpow2.f32 %v848_v44  ;;  %v1064_v19 = vpack.c.bf16 %v2188_v55, %v2183_v15 }
 0x23b   : > { %2473 = vst [vmem:[#allocation21_spill] sm:$0xff] %v2192_v61  ;;  %v2197_v7 = vpop.eup %1465  ;;  %v922_v57 = vmul.f32 1.442695, %v812_v9  ;;  %1479 = vpow2.f32 %v926_v39  ;;  %v1046_v44 = vpack.c.bf16 %v2134_v45, %v2129_v41  ;;  %v787_v39 = vsub.f32 %v1898_v28, %v2114_v63  ;;  %v2476_v41 = vld [vmem:[#allocation18_spill] sm:$0xff] }
 0x23c   : > { %v972_v40 = vadd.f32 %v2143_v53, %v971_v34  ;;  %2474 = vst [vmem:[#allocation11_spill] sm:$0xff] %v2197_v7  ;;  %v2203_v32 = vpop.eup %1467  ;;  %v995_v5 = vadd.f32 %v2197_v7, %v2192_v61  ;;  %1481 = vpow2.f32 %v852_v27  ;;  %v860_v53 = vmul.f32 1.442695, %v781_v14  ;;  %1090 = vmatpush.bf16.msra.mxu3 %v1064_v19 }
 0x23d   : > { %v2208_v20 = vpop.eup %1469  ;;  %1483 = vpow2.f32 %v930_v16  ;;  %1077 = vmatpush.bf16.msra.mxu2 %v1046_v44  ;;  %v789_v45 = vsub.f32 %v2476_v41, %v2114_v63  ;;  %v868_v28 = vmul.f32 1.442695, %v785_v21  ;;  %v2477_v44 = vld [vmem:[#allocation19_spill] sm:$0xff] }
 0x23e   : > { %v973_v2 = vadd.f32 %v2147_v49, %v972_v40  ;;  %v2212_v26 = vpop.eup %1471  ;;  %v996_v62 = vadd.f32 %v2208_v20, %v995_v5  ;;  %1485 = vpow2.f32 %v856_v50  ;;  %v1062_v40 = vpack.c.bf16 %v2203_v32, %v2179_v17 }
 0x23f   : > { %v2218_v9 = vpop.eup %1473  ;;  %1487 = vpow2.f32 %v922_v57  ;;  %v1044_v57 = vpack.c.bf16 %v2125_v38, %v2120_v4  ;;  %v791_v5 = vsub.f32 %v1914_v36, %v2114_v63  ;;  %v2478_v36 = vld [vmem:[#allocation20_spill] sm:$0xff]  ;;  %v876_v41 = vmul.f32 1.442695, %v789_v45 }
 0x240   : > { %v974_v59 = vadd.f32 %v2152_v22, %v973_v2  ;;  %2475 = vst [vmem:[#allocation12_spill] sm:$0xff] %v2218_v9  ;;  %v2224_v14 = vpop.eup %1475  ;;  %v997_v16 = vadd.f32 %v2218_v9, %v996_v62  ;;  %1489 = vpow2.f32 %v860_v53  ;;  %1091 = vmatpush.bf16.msra.mxu3 %v1062_v40  ;;  %v872_v53 = vmul.f32 1.442695, %v787_v39 }
 0x241   : > { %v2228_v2 = vpop.eup %1477  ;;  %1491 = vpow2.f32 %v864_v24  ;;  %v1060_v21 = vpack.c.bf16 %v2224_v14, %v2212_v26  ;;  %v793_v40 = vsub.f32 %v2477_v44, %v2114_v63  ;;  %1078 = vmatpush.bf16.msra.mxu2 %v1044_v57  ;;  %v797_v39 = vsub.f32 %v2478_v36, %v2114_v63  ;;  %v2479_v24 = vld [vmem:[#allocation22_spill] sm:$0xff]  ;;  %v2481_v36 = vld [vmem:[#allocation24_spill] sm:$0xff] }
 0x242   : > { %v975_v34 = vadd.f32 %v2156_v1, %v974_v59  ;;  %v1480_v29 = vpop.eup %1479  ;;  %v998_v19 = vadd.f32 %v2228_v2, %v997_v16  ;;  %v799_v16 = vsub.f32 %v2479_v24, %v2114_v63  ;;  %1493 = vpow2.f32 %v868_v28  ;;  %v2482_v24 = vld [vmem:[#allocation25_spill] sm:$0xff] }
 0x243   : > { %v2238_v59 = vpop.eup %1481  ;;  %v1042_v57 = vpack.c.bf16 %v2116_v31, %v2111_v12  ;;  %v803_v61 = vsub.f32 %v2481_v36, %v2114_v63  ;;  %1495 = vpow2.f32 %v872_v53  ;;  %v880_v28 = vmul.f32 1.442695, %v791_v5 }
 0x244   : > { %v976_v27 = vadd.f32 %v2161_v56, %v975_v34  ;;  %v1484_v34 = vpop.eup %1483  ;;  %v999_v4 = vadd.f32 %v2238_v59, %v998_v19  ;;  %1092 = vmatpush.bf16.msra.mxu3 %v1060_v21  ;;  %v884_v9 = vmul.f32 1.442695, %v793_v40  ;;  %v807_v12 = vsub.f32 %v1892_v25, %v2114_v63 }
 0x245   : > { %v2250_v38 = vpop.eup %1485  ;;  %v1058_v45 = vpack.c.bf16 %v1484_v34, %v1480_v29  ;;  %1079 = vmatpush.bf16.msra.mxu2 %v1042_v57  ;;  %v827_v31 = vsub.f32 %v2029_v46, %v2114_v63  ;;  %1497 = vpow2.f32 %v876_v41  ;;  %v1040_v40 = vpack.c.bf16 %v2105_v23, %v2098_v8 }
 0x246   : > { %v977_v50 = vadd.f32 %v2165_v18, %v976_v27  ;;  %v795_v27 = vsub.f32 %v1926_v42, %v2114_v63  ;;  %v801_v42 = vsub.f32 %v2480_v30, %v2114_v63  ;;  %v1000_v19 = vadd.f32 %v2250_v38, %v999_v4 }
 0x247   : > { %v823_v57 = vsub.f32 %v1998_v6, %v2114_v63  ;;  %v829_v25 = vsub.f32 %v2038_v0, %v2114_v63  ;;  %1499 = vpow2.f32 %v880_v28  ;;  %v825_v8 = vsub.f32 %v2019_v58, %v2114_v63 }
 0x248   : > { %v978_v62 = vadd.f32 %v2170_v48, %v977_v50  ;;  %v1488_v50 = vpop.eup %1487  ;;  %v888_v53 = vmul.f32 1.442695, %v795_v27  ;;  %1093 = vmatpush.bf16.msra.mxu3 %v1058_v45  ;;  %1501 = vpow2.f32 %v884_v9  ;;  %v900_v23 = vmul.f32 1.442695, %v801_v42 }
 0x249   : > { %v2262_v7 = vpop.eup %1489  ;;  %v1056_v46 = vpack.c.bf16 %v1488_v50, %v2174_v35  ;;  %1080 = vmatpush.bf16.msra.mxu2 %v1040_v40  ;;  %v952_v6 = vmul.f32 1.442695, %v827_v31  ;;  %v1038_v9 = vpack.c.bf16 %v2091_v13, %v2084_v3  ;;  %v819_v58 = vsub.f32 %v1948_v54, %v2114_v63 }
 0x24a   : > { %v979_v44 = vadd.f32 %v2174_v35, %v978_v62  ;;  %v805_v62 = vsub.f32 %v2482_v24, %v2114_v63  ;;  %v1001_v30 = vadd.f32 %v2262_v7, %v1000_v19  ;;  %v2269_v4 = vpop.eup %1491  ;;  %1503 = vpow2.f32 %v888_v53 }
 0x24b   : > { %v2278_v19 = vpop.eup %1493  ;;  %v956_v28 = vmul.f32 1.442695, %v829_v25  ;;  %v1054_v42 = vpack.c.bf16 %v2170_v48, %v2165_v18  ;;  %v944_v45 = vmul.f32 1.442695, %v823_v57  ;;  %v821_v13 = vsub.f32 %v1968_v52, %v2114_v63 }
 0x24c   : > { %v980_v21 = vadd.f32 %v1488_v50, %v979_v44  ;;  %v892_v44 = vmul.f32 1.442695, %v797_v39  ;;  %v1002_v36 = vadd.f32 %v2269_v4, %v1001_v30  ;;  %v2286_v41 = vpop.eup %1495  ;;  %1094 = vmatpush.bf16.msra.mxu3 %v1056_v46  ;;  %v904_v24 = vmul.f32 1.442695, %v803_v61 }
 0x24d   : > { %1081 = vmatpush.bf16.msra.mxu2 %v1038_v9  ;;  %v948_v30 = vmul.f32 1.442695, %v825_v8  ;;  %v815_v53 = vsub.f32 %v1928_v43, %v2114_v63  ;;  %v1052_v52 = vpack.c.bf16 %v2161_v56, %v2156_v1  ;;  %v940_v40 = vmul.f32 1.442695, %v821_v13  ;;  %v1322_v9 = vld [vmem:[#allocation3 + $0x8] sm:$0xf0] }
 0x24e   : > { %v981_v5 = vadd.f32 %v1480_v29, %v980_v21  ;;  %v896_v29 = vmul.f32 1.442695, %v799_v16  ;;  %v1003_v39 = vadd.f32 %v2278_v19, %v1002_v36  ;;  %1505 = vpow2.f32 %v892_v44  ;;  %v2483_v16 = vld [vmem:[#allocation17_spill] sm:$0xff] }
 0x24f   : > { %v809_v50 = vsub.f32 %v2483_v16, %v2114_v63  ;;  %v936_v36 = vmul.f32 1.442695, %v819_v58  ;;  %v1034_v56 = vpack.c.bf16 %v2062_v10, %v2058_v11  ;;  %v811_v25 = vsub.f32 %v1908_v33, %v2114_v63  ;;  %v1336_v11 = vld [vmem:[#allocation3 + $0x4] sm:$0xf] }
 0x250   : > { %v982_v27 = vadd.f32 %v1484_v34, %v981_v5  ;;  %v1004_v35 = vadd.f32 %v2286_v41, %v1003_v39  ;;  %v2294_v34 = vpop.eup %1497  ;;  %1507 = vpow2.f32 %v896_v29  ;;  %1095 = vmatpush.bf16.msra.mxu3 %v1054_v42  ;;  %v908_v5 = vmul.f32 1.442695, %v805_v62  ;;  %v1337_v39 = vld [vmem:[#allocation3 + $0x4] sm:$0xf0] }
 0x251   : > { %v2304_v3 = vpop.eup %1499  ;;  %1509 = vpow2.f32 %v900_v23  ;;  %v813_v8 = vsub.f32 %v1916_v37, %v2114_v63  ;;  %v2484_v23 = vpack.c.bf16 %v2152_v22, %v2147_v49  ;;  %v920_v37 = vmul.f32 1.442695, %v811_v25 }
 0x252   : > { %v983_v0 = vadd.f32 %v2212_v26, %v982_v27  ;;  %v1005_v21 = vadd.f32 %v2294_v34, %v1004_v35  ;;  %v2308_v54 = vpop.eup %1501  ;;  %1511 = vpow2.f32 %v952_v6  ;;  %v1045_v13 = vpack.c.bf16 %v2294_v34, %v2286_v41 }
 0x253   : > { %v1504_v31 = vpop.eup %1503  ;;  %1513 = vpow2.f32 %v956_v28  ;;  %v1047_v49 = vpack.c.bf16 %v2308_v54, %v2304_v3  ;;  %v924_v28 = vmul.f32 1.442695, %v813_v8  ;;  %v1041_v34 = vpack.c.bf16 %v2262_v7, %v2250_v38 }
 0x254   : > { %v984_v26 = vadd.f32 %v2224_v14, %v983_v0  ;;  %v1006_v48 = vadd.f32 %v2304_v3, %v1005_v21  ;;  %v1036_v14 = vpack.c.bf16 %v2077_v60, %v2070_v51  ;;  %v1506_v61 = vpop.eup %1505  ;;  %1515 = vpow2.f32 %v944_v45  ;;  %1096 = vmatpush.bf16.msra.mxu3 %v1052_v52 }
 0x255   : > { %v817_v51 = vsub.f32 %v1936_v47, %v2114_v63  ;;  %v912_v60 = vmul.f32 1.442695, %v807_v12  ;;  %1517 = vpow2.f32 %v948_v30  ;;  %v916_v47 = vmul.f32 1.442695, %v809_v50 }
 0x256   : > { %v985_v18 = vadd.f32 %v2179_v17, %v984_v26  ;;  %v1007_v17 = vadd.f32 %v2308_v54, %v1006_v48  ;;  %1082 = vmatpush.bf16.msra.mxu2 %v1036_v14  ;;  %v2322_v43 = vpop.eup %1507  ;;  %1519 = vpow2.f32 %v904_v24  ;;  %v1049_v12 = vpack.c.bf16 %v1506_v61, %v1504_v31 }
 0x257   : > { %v2327_v57 = vpop.eup %1509  ;;  %1521 = vpow2.f32 %v908_v5  ;;  %v932_v33 = vmul.f32 1.442695, %v817_v51  ;;  %v1325_v63 = vor.u32 %v1336_v11, %v1322_v9  ;;  %v1039_v51 = vpack.c.bf16 %v2238_v59, %v2228_v2 }
 0x258   : > { %v986_v44 = vadd.f32 %v2203_v32, %v985_v18  ;;  %v1008_v1 = vadd.f32 %v1504_v31, %v1007_v17  ;;  %v1320_v32 = vld [vmem:[#allocation3] sm:$0xf]  ;;  %v2331_v46 = vpop.eup %1511  ;;  %1523 = vpow2.f32 %v936_v36  ;;  %1097 = vmatpush.bf16.msra.mxu3 %v2484_v23  ;;  %v1043_v31 = vpack.c.bf16 %v2278_v19, %v2269_v4 }
 0x259   : > { %v2336_v10 = vpop.eup %1513  ;;  %1525 = vpow2.f32 %v940_v40  ;;  %v2485_v40 = vld [vmem:[#allocation12_spill] sm:$0xff]  ;;  %v1051_v59 = vpack.c.bf16 %v2327_v57, %v2322_v43  ;;  %v1139_v23 = vstv %s1138_s14 }
 0x25a   : > { %v987_v62 = vadd.f32 %v2183_v15, %v986_v44  ;;  %v928_v15 = vmul.f32 1.442695, %v815_v53  ;;  %v1009_v29 = vadd.f32 %v1506_v61, %v1008_v1  ;;  %1083 = vmatpush.bf16.msra.mxu2 %v1034_v56  ;;  %v1516_v6 = vpop.eup %1515  ;;  %1527 = vpow2.f32 %v912_v60  ;;  %v2486_v56 = vld [vmem:[#allocation21_spill] sm:$0xff] }
 0x25b   : > { %v1065_v35 = vpack.c.bf16 %v2336_v10, %v2331_v46  ;;  %v1518_v16 = vpop.eup %1517  ;;  %1529 = vpow2.f32 %v916_v47  ;;  %1098 = vmatmul.bf16.vlgmr.msra.gmra.mxu3 %v1325_v63 }
 0x25c   : > { %v2334_v27 = vadd.f32 %v2188_v55, %v987_v62  ;;  %v2343_v55 = vor.u32 %v1337_v39, %v1320_v32  ;;  %v1010_v0 = vadd.f32 %v2322_v43, %v1009_v29  ;;  %v1520_v22 = vpop.eup %1519  ;;  %1531 = vpow2.f32 %v928_v15  ;;  %v2487_v32 = vld [vmem:[#allocation11_spill] sm:$0xff] }
 0x25d   : > { %1118 = vmatpush.bf16.msrb.mxu3 %v1065_v35  ;;  %v1522_v58 = vpop.eup %1521  ;;  %1533 = vpow2.f32 %v932_v33  ;;  %v1063_v45 = vpack.c.bf16 %v1518_v16, %v1516_v6  ;;  %v1037_v62 = vpack.c.bf16 %v2485_v40, %v2208_v20  ;;  %v1035_v25 = vpack.c.bf16 %v2487_v32, %v2486_v56 }
 0x25e   : > { %1104 = vmatpush.bf16.msrb.mxu2 %v1049_v12  ;;  %v1011_v50 = vadd.f32 %v2327_v57, %v1010_v0  ;;  %v1524_v42 = vpop.eup %1523  ;;  %1535 = vpow2.f32 %v920_v37  ;;  %v1053_v38 = vpack.c.bf16 %v1522_v58, %v1520_v22  ;;  %v989_v20 = vrot.slane %v2334_v27, 4 }
 0x25f   : > { %1084 = vmatmul.bf16.vlgmr.msra.gmra.mxu2 %v2343_v55  ;;  %v1526_v21 = vpop.eup %1525  ;;  %1537 = vpow2.f32 %v924_v28 }
 0x260   : > { %v1012_v26 = vadd.f32 %v1520_v22, %v1011_v50  ;;  %v1528_v24 = vpop.eup %1527  ;;  %v1061_v48 = vpack.c.bf16 %v1526_v21, %v1524_v42  ;;  %v990_v15 = vadd.f32 %v989_v20, %v2334_v27  ;;  %v1543_v27 = vld [vmem:[%s1784_s8] sm:$0xff] }
 0x261   : > { %1119 = vmatpush.bf16.msrb.mxu3 %v1063_v45  ;;  %v1530_v30 = vpop.eup %1529 }
 0x262   : > { %1105 = vmatpush.bf16.msrb.mxu2 %v1047_v49  ;;  %v1013_v3 = vadd.f32 %v1522_v58, %v1012_v26  ;;  %v1532_v54 = vpop.eup %1531  ;;  %v1055_v19 = vpack.c.bf16 %v1530_v30, %v1528_v24  ;;  %v991_v29 = vrot.slane %v990_v15, 2  ;;  %v1544_v58 = vld [vmem:[%s1784_s8 + $0x10] sm:$0xff] }
 0x263   : > { %v1534_v14 = vpop.eup %1533 }
 0x264   : > { %v1014_v18 = vadd.f32 %v1528_v24, %v1013_v3  ;;  %v1536_v5 = vpop.eup %1535  ;;  %v1059_v61 = vpack.c.bf16 %v1534_v14, %v1532_v54  ;;  %v992_v39 = vadd.f32 %v991_v29, %v990_v15 }
 0x265   : > { %1120 = vmatpush.bf16.msrb.mxu3 %v1061_v48  ;;  %v1538_v41 = vpop.eup %1537 }
 0x266   : > { %1106 = vmatpush.bf16.msrb.mxu2 %v1045_v13  ;;  %v1015_v53 = vadd.f32 %v1530_v30, %v1014_v18  ;;  %v1057_v17 = vpack.c.bf16 %v1538_v41, %v1536_v5  ;;  %v993_v11 = vrot.slane %v992_v39, 1  ;;  %v1545_v18 = vld [vmem:[%s1784_s8 + $0x8] sm:$0xff] }
 0x268   : > { %v1016_v52 = vadd.f32 %v1536_v5, %v1015_v53  ;;  %v994_v8 = vadd.f32 %v993_v11, %v992_v39 }
 0x269   : > { %1121 = vmatpush.bf16.msrb.mxu3 %v1059_v61 }
 0x26a   : > { %1107 = vmatpush.bf16.msrb.mxu2 %v1043_v31  ;;  %v1017_v44 = vadd.f32 %v1538_v41, %v1016_v52  ;;  %1539 = vrcp.f32 %v994_v8  ;;  %v1546_v52 = vld [vmem:[%s1784_s8 + $0x18] sm:$0xff] }
 0x26c   : > { %v1018_v36 = vadd.f32 %v1532_v54, %v1017_v44 }
 0x26d   : > { %1122 = vmatpush.bf16.msrb.mxu3 %v1057_v17 }
 0x26e   : > { %1108 = vmatpush.bf16.msrb.mxu2 %v1041_v34  ;;  %v1019_v60 = vadd.f32 %v1534_v14, %v1018_v36 }
 0x270   : > { %v1020_v4 = vadd.f32 %v1524_v42, %v1019_v60 }
 0x271   : > { %1123 = vmatpush.bf16.msrb.mxu3 %v1055_v19 }
 0x272   : > { %1109 = vmatpush.bf16.msrb.mxu2 %v1039_v51  ;;  %v1021_v1 = vadd.f32 %v1526_v21, %v1020_v4 }
 0x274   : > { %v1022_v7 = vadd.f32 %v1516_v6, %v1021_v1 }
 0x275   : > { %1124 = vmatpush.bf16.msrb.mxu3 %v1053_v38 }
 0x276   : > { %1110 = vmatpush.bf16.msrb.mxu2 %v1037_v62  ;;  %v1023_v47 = vadd.f32 %v1518_v16, %v1022_v7 }
 0x278   : > { %v1024_v2 = vadd.f32 %v2331_v46, %v1023_v47 }
 0x279   : > { %1125 = vmatpush.bf16.msrb.mxu3 %v1051_v59 }
 0x27a   : > { %1111 = vmatpush.bf16.msrb.mxu2 %v1035_v25  ;;  %v1025_v12 = vadd.f32 %v2336_v10, %v1024_v2  ;;  %v1540_v10 = vpop.eup %1539 }
 0x27c   : > { %1126 = vmatmul.bf16.vlgmr.msrb.gmra.mxu3 %v1325_v63  ;;  %v1026_v33 = vrot.slane %v1025_v12, 4 }
 0x27d   : > { %1112 = vmatmul.bf16.vlgmr.msrb.gmra.mxu2 %v2343_v55 }
 0x27e   : > { %v1027_v0 = vadd.f32 %v1026_v33, %v1025_v12 }
 0x280   : > { %v1028_v63 = vrot.slane %v1027_v0, 2 }
 0x282   : > { %v1029_v50 = vadd.f32 %v1028_v63, %v1027_v0 }
 0x284   : > { %v1030_v42 = vrot.slane %v1029_v50, 1 }
 0x286   : > { %v1031_v26 = vadd.f32 %v1030_v42, %v1029_v50 }
 0x288   : > { %1541 = vrcp.f32 %v1031_v26 }
 0x28e   : > { %v1542_v24 = vpop.eup %1541 }
 0x2de   : > { %v1099_v43 = vpop.f32.mrf.mxu3 }
 0x2e2   : > { %v1085_v46 = vpop.f32.mrf.mxu2 }
 0x2e3   : > { %v1100_v57 = vadd.f32 %v1099_v43, %v1085_v46 }
 0x2e5   : > { %v1134_v55 = vmul.f32 %v1540_v10, %v1100_v57 }
 0x2e6   : > { %v1101_v16 = vpop.f32.mrf.mxu3 }
 0x2e7   : > { %v1140_v6 = vmul.f32 %v1139_v23, %v1134_v55 }
 0x2e9   : > { %v1144_v9 = vadd.f32 %v1543_v27, %v1140_v6 }
 0x2ea   : > { %v1087_v35 = vpop.f32.mrf.mxu2 }
 0x2eb   : > { %1148 = vst [vmem:[%s2374_s17] sm:$0xff] %v1144_v9  ;;  %v1102_v37 = vadd.f32 %v1101_v16, %v1087_v35 }
 0x2ed   : > { %v1136_v49 = vmul.f32 %v1540_v10, %v1102_v37 }
 0x2ef   : > { %v1142_v22 = vmul.f32 %v1139_v23, %v1136_v49 }
 0x2f1   : > { %v1146_v28 = vadd.f32 %v1544_v58, %v1142_v22 }
 0x2f3   : > { %1150 = vst [vmem:[%s2374_s17 + $0x10] sm:$0xff] %v1146_v28 }
 0x2ff   : > { %v1127_v21 = vpop.f32.mrf.mxu3 }
 0x300   : > { %v1113_v45 = vpop.f32.mrf.mxu2 }
 0x301   : > { %v1128_v13 = vadd.f32 %v1127_v21, %v1113_v45 }
 0x303   : > { %v1135_v3 = vmul.f32 %v1542_v24, %v1128_v13 }
 0x305   : > { %v1141_v30 = vmul.f32 %v1139_v23, %v1135_v3 }
 0x307   : > { %v1145_v48 = vadd.f32 %v1545_v18, %v1141_v30  ;;  %v1129_v14 = vpop.f32.mrf.mxu3 }
 0x308   : > { %v1115_v54 = vpop.f32.mrf.mxu2 }
 0x309   : > { %1149 = vst [vmem:[%s2374_s17 + $0x8] sm:$0xff] %v1145_v48  ;;  %v1130_v31 = vadd.f32 %v1129_v14, %v1115_v54 }
 0x30b   : > { %v1137_v53 = vmul.f32 %v1542_v24, %v1130_v31 }
 0x30d   : > { %v1143_v5 = vmul.f32 %v1139_v23, %v1137_v53 }
 0x30f   : > { %v1147_v61 = vadd.f32 %v1546_v52, %v1143_v5 }
 0x311   : > { %1151 = vst [vmem:[%s2374_s17 + $0x18] sm:$0xff] %v1147_v61 }
 0x312   : > { %1604 = shalt.err (!%p1601_p13)
}
 0x313   : > { %s1664_s9 = smov 256   ;;  %s1665_s8 = smov 16  }
 0x314   : > { %1343 = dma.vmem_to_hbm [thread:$0]  (%p1755_p9), %s1168_s20, 512, %s1170_s21, %s1153_s26, %s1664_s9, %s1664_s9, %s1665_s8  }
 0x315 PF: > { %s1184_s17 = sand.u32 1, %s1639_s23   ;;  %p1350_p0 = pnand %p1259_p12, %p1762_p11 }
 0x316   : > { %s1185_s10 = scalar_lea.sflag [#allocation7], %s1184_s17 }
 0x317   : > { %p1351_p1 = pneg %p1350_p0 }
 0x319   : > { %1634 = dma.done.wait (%p1351_p1), %s1185_s10, 512  }
 0x31a   : > { %1636 = vsyncadd (%p1351_p1), %s1185_s10, 4294966784  ;;  %s23_s28 = sadd.s32 1, %s1659_s28   ;;  %s2488_s23 = smov %s1643_s24 }
 0x31b   : > { %p20_p2 = scmp.ge.s32.totalorder %s23_s28, 4   ;;  %s2489_s24 = smov %s1647_s25 }
 0x31c   : > { %s2490_s25 = smov %s1760_s12  ;;  %s2491_s26 = smov %s1655_s27 }
 0x31d   : > { %s2492_s27 = smov %s2494_s30  ;;  %22 = sbr.rel (!%p20_p2) target bundleno = 8 (0x8), region = 94 }
 0x322   :  { %1191 = vsyncpa [#allocation6], 1 }
 0x323   :  { %1193 = vsyncpa [#allocation6 + $0x1], 1 }
 0x324   :  { %1194 = vsyncpa [#allocation7], 1 }
 0x325   :  { %1196 = vsyncpa [#allocation7 + $0x1], 1 }

</bundles_post_ra>
